<compile_context>
chip_gen: v6e
topology: v6e:2x2x1
jax: 0.10.0
libtpu: 0.0.40
codegen_flags: <defaults>
</compile_context>

<pallas_src>
import functools

import jax
import jax.numpy as jnp
from jax.experimental import pallas as pl
from jax.experimental.pallas import tpu as pltpu

LANE = 128


def _round_up(v, m):
    return -(-v // m) * m


# ----------------------------------------------------------------------------
# In-kernel helper: one full ARMAConv (all K stacks packed along lanes)
# ----------------------------------------------------------------------------
def _arma_conv_packed(x, a, wi, wbd, wr, b, mred, *, num_layers, apply_act, cd):
    """x: [N, F_in] (cd), a: [N, N] (cd), wi/wr: [F_in, P] (cd),
    wbd: [P, P] block-diag (cd), b: [1, P] (f32), mred: [P, F_out] (cd).
    Returns f32 [N, F_out] = mean over the K stacks."""
    # Shared root term (root_weight is shared across layers; dropout is identity in eval).
    root = jnp.dot(x, wr, preferred_element_type=jnp.float32) + b        # [N, P] f32
    h = jnp.dot(x, wi, preferred_element_type=jnp.float32)               # t = 0: X @ W_init
    for t in range(num_layers):
        if t > 0:
            h = jnp.dot(h.astype(cd), wbd, preferred_element_type=jnp.float32)  # shared W
        # propagate: single wide A_hat @ [N, K*F_out] matmul shared by all K stacks
        h = jnp.dot(a, h.astype(cd), preferred_element_type=jnp.float32) + root
        if apply_act:
            h = jnp.maximum(h, 0.0)
    # mean over the K stacks packed along lanes (tiny matmul instead of lane slices)
    return jnp.dot(h.astype(cd), mred, preferred_element_type=jnp.float32)


# ----------------------------------------------------------------------------
# Single fused Pallas kernel: conv1 -> (ReLU, folded) -> conv2 -> log_softmax
# ----------------------------------------------------------------------------
def arma_forward_kernel(x_ref, a_ref,
                        wi1_ref, wbd1_ref, wr1_ref, b1_ref, m1_ref,
                        wi2_ref, wbd2_ref, wr2_ref, b2_ref, m2_ref,
                        o_ref, *, num_layers, compute_dtype):
    x = x_ref[...]
    a = a_ref[...]

    # conv1 (internal act = ReLU). The module's outer F.relu is a no-op on the
    # already non-negative mean of ReLU'd stacks, so it is folded away.
    h = _arma_conv_packed(x, a, wi1_ref[...], wbd1_ref[...], wr1_ref[...],
                          b1_ref[...], m1_ref[...],
                          num_layers=num_layers, apply_act=True, cd=compute_dtype)

    # F.dropout between the convs is identity in eval mode.

    # conv2 (act = identity).
    z = _arma_conv_packed(h.astype(compute_dtype), a, wi2_ref[...], wbd2_ref[...],
                          wr2_ref[...], b2_ref[...], m2_ref[...],
                          num_layers=num_layers, apply_act=False, cd=compute_dtype)

    # Fused log_softmax over the class (last) dimension.
    m = jnp.max(z, axis=1, keepdims=True)
    lse = jnp.log(jnp.sum(jnp.exp(z - m), axis=1, keepdims=True)) + m
    o_ref[...] = (z - lse).astype(o_ref.dtype)


# ----------------------------------------------------------------------------
# Wrapper: parameter packing + pallas_call
# ----------------------------------------------------------------------------
def _pack_arma_conv_params(p, compute_dtype):
    """Pack per-stack ARMAConv weights into lane-dense packed operands."""
    w_init, w, w_root, bias = p["w_init"], p["w"], p["w_root"], p["bias"]
    K, f_in, f_out = w_init.shape
    P = _round_up(K * f_out, LANE)  # lane-pad K*F_out to a multiple of 128

    def pack_lanes(t):  # [K, f_in, f_out] -> [f_in, P]
        t = jnp.transpose(t, (1, 0, 2)).reshape(f_in, K * f_out)
        return jnp.pad(t, ((0, 0), (0, P - K * f_out))).astype(compute_dtype)

    wi = pack_lanes(w_init)
    wr = pack_lanes(w_root)

    wbd = jnp.zeros((P, P), jnp.float32)       # block-diagonal shared layer weight
    mred = jnp.zeros((P, f_out), jnp.float32)  # mean-over-stacks reduction matrix
    for k in range(K):
        wbd = wbd.at[k * f_out:(k + 1) * f_out, k * f_out:(k + 1) * f_out].set(w[k])
        mred = mred.at[k * f_out:(k + 1) * f_out, :].set(jnp.eye(f_out, dtype=jnp.float32) / K)

    b = jnp.pad(bias.reshape(1, K * f_out), ((0, 0), (0, P - K * f_out))).astype(jnp.float32)
    return wi, wbd.astype(compute_dtype), wr, b, mred.astype(compute_dtype)


def arma_forward(x, a_hat, p1, p2, *, num_layers=2, compute_dtype=jnp.bfloat16):
    """Full ARMA forward (eval mode): conv1 -> ReLU -> conv2 -> log_softmax."""
    N, _ = x.shape
    f_out = p2["w_init"].shape[-1]

    wi1, wbd1, wr1, b1, m1 = _pack_arma_conv_params(p1, compute_dtype)
    wi2, wbd2, wr2, b2, m2 = _pack_arma_conv_params(p2, compute_dtype)

    kernel = functools.partial(arma_forward_kernel, num_layers=num_layers,
                               compute_dtype=compute_dtype)
    vmem = pl.BlockSpec(memory_space=pltpu.MemorySpace.VMEM)
    return pl.pallas_call(
        kernel,
        out_shape=jax.ShapeDtypeStruct((N, f_out), jnp.float32),
        in_specs=[vmem] * 12,
        out_specs=vmem,
        compiler_params=pltpu.CompilerParams(vmem_limit_bytes=48 * 1024 * 1024),
    )(x.astype(compute_dtype), a_hat.astype(compute_dtype),
      wi1, wbd1, wr1, b1, m1, wi2, wbd2, wr2, b2, m2)


# ----------------------------------------------------------------------------
# Glue: graph normalization and parameter init
# ----------------------------------------------------------------------------
def build_norm_adj(edge_index, num_nodes):
    """Dense symmetric gcn_norm (add_self_loops=False): A_hat = D^-1/2 A D^-1/2."""
    row, col = edge_index  # source, target
    adj = jnp.zeros((num_nodes, num_nodes), jnp.float32).at[col, row].add(1.0)
    deg = jnp.zeros((num_nodes,), jnp.float32).at[col].add(1.0)
    dinv = jnp.where(deg > 0, 1.0 / jnp.sqrt(deg), 0.0)
    return adj * dinv[:, None] * dinv[None, :]


def glorot(key, shape):
    fan_in, fan_out = shape[-2], shape[-1]
    a = jnp.sqrt(6.0 / (fan_in + fan_out))
    return jax.random.uniform(key, shape, jnp.float32, -a, a)


def init_arma_conv_params(key, f_in, f_out, num_stacks):
    k1, k2, k3 = jax.random.split(key, 3)
    return dict(
        w_init=glorot(k1, (num_stacks, f_in, f_out)),
        w=glorot(k2, (num_stacks, f_out, f_out)),
        w_root=glorot(k3, (num_stacks, f_in, f_out)),
        bias=jnp.zeros((num_stacks, 1, f_out), jnp.float32),
    )


# ----------------------------------------------------------------------------
# Plain-JAX reference (per-stack, f32) for correctness checks
# ----------------------------------------------------------------------------
def arma_conv_ref(x, a_hat, p, apply_act):
    K = p["w_init"].shape[0]
    outs = []
    for k in range(K):
        root = x @ p["w_root"][k] + p["bias"][k]
        out = x
        for t in range(2):
            w_t = p["w_init"][k] if t == 0 else p["w"][k]
            out = a_hat @ (out @ w_t) + root
            if apply_act:
                out = jnp.maximum(out, 0.0)
        outs.append(out)
    return jnp.mean(jnp.stack(outs), axis=0)


def arma_forward_ref(x, a_hat, p1, p2):
    h = jnp.maximum(arma_conv_ref(x, a_hat, p1, True), 0.0)
    out = arma_conv_ref(h, a_hat, p2, False)
    return jax.nn.log_softmax(out, axis=1)


if __name__ == "__main__":
    N = 16               # nodes
    IN_CH, HID_CH, OUT_CH = 16, 32, 8
    NUM_STACKS = 3

    key = jax.random.PRNGKey(0)
    kx, kp1, kp2 = jax.random.split(key, 3)

    x = jax.random.normal(kx, (N, IN_CH), jnp.float32)

    # Small undirected graph: ring + a few chords (both directions included).
    src = jnp.arange(N)
    dst = (src + 1) % N
    csrc = jnp.arange(0, N, 4)
    cdst = (csrc + N // 2) % N
    row = jnp.concatenate([src, dst, csrc, cdst])
    col = jnp.concatenate([dst, src, cdst, csrc])
    edge_index = jnp.stack([row, col]).astype(jnp.int32)

    a_hat = build_norm_adj(edge_index, N)

    p1 = init_arma_conv_params(kp1, IN_CH, HID_CH, NUM_STACKS)
    p2 = init_arma_conv_params(kp2, HID_CH, OUT_CH, NUM_STACKS)

    ref = arma_forward_ref(x, a_hat, p1, p2)

    # 1) exact-math check: f32 MXU operands -> tight tolerance vs reference
    out_f32 = jax.block_until_ready(
        arma_forward(x, a_hat, p1, p2, compute_dtype=jnp.float32))
    assert out_f32.shape == (N, OUT_CH)
    assert jnp.allclose(out_f32, ref, atol=1e-4, rtol=1e-4), "f32 kernel mismatch vs reference"

    # 2) fast path: bf16 MXU operands, f32 accumulation -> loose tolerance
    out_bf16 = jax.block_until_ready(
        arma_forward(x, a_hat, p1, p2, compute_dtype=jnp.bfloat16))
    assert out_bf16.shape == (N, OUT_CH)
    assert jnp.allclose(jnp.sum(jnp.exp(out_bf16), axis=1), 1.0, atol=1e-3), \
        "log_softmax rows must normalize"
    assert jnp.allclose(out_bf16, ref, atol=0.15, rtol=0.15), \
        "bf16 kernel deviates too much from f32 reference"

    print("KERNEL_OK")
</pallas_src>

<mosaic_0001>
module attributes {stable_mosaic.version = 11 : i64} {
  func.func @arma_forward_kernel(%arg0: memref<16x16xf32, #tpu.memory_space<vmem>>, %arg1: memref<16x16xf32, #tpu.memory_space<vmem>>, %arg2: memref<16x128xf32, #tpu.memory_space<vmem>>, %arg3: memref<128x128xf32, #tpu.memory_space<vmem>>, %arg4: memref<16x128xf32, #tpu.memory_space<vmem>>, %arg5: memref<1x128xf32, #tpu.memory_space<vmem>>, %arg6: memref<128x32xf32, #tpu.memory_space<vmem>>, %arg7: memref<32x128xf32, #tpu.memory_space<vmem>>, %arg8: memref<128x128xf32, #tpu.memory_space<vmem>>, %arg9: memref<32x128xf32, #tpu.memory_space<vmem>>, %arg10: memref<1x128xf32, #tpu.memory_space<vmem>>, %arg11: memref<128x8xf32, #tpu.memory_space<vmem>>, %arg12: memref<16x8xf32, #tpu.memory_space<vmem>>) attributes {dimension_semantics = [], scalar_prefetch = 0 : i64, scratch_operands = 0 : i64, tpu.core_type = #tpu.core_type<tc>} {
    %c0 = arith.constant 0 : index
    %c0_0 = arith.constant 0 : index
    %0 = vector.load %arg0[%c0, %c0_0] : memref<16x16xf32, #tpu.memory_space<vmem>>, vector<16x16xf32>
    %c0_1 = arith.constant 0 : index
    %c0_2 = arith.constant 0 : index
    %1 = vector.load %arg1[%c0_1, %c0_2] : memref<16x16xf32, #tpu.memory_space<vmem>>, vector<16x16xf32>
    %c0_3 = arith.constant 0 : index
    %c0_4 = arith.constant 0 : index
    %2 = vector.load %arg2[%c0_3, %c0_4] : memref<16x128xf32, #tpu.memory_space<vmem>>, vector<16x128xf32>
    %c0_5 = arith.constant 0 : index
    %c0_6 = arith.constant 0 : index
    %3 = vector.load %arg3[%c0_5, %c0_6] : memref<128x128xf32, #tpu.memory_space<vmem>>, vector<128x128xf32>
    %c0_7 = arith.constant 0 : index
    %c0_8 = arith.constant 0 : index
    %4 = vector.load %arg4[%c0_7, %c0_8] : memref<16x128xf32, #tpu.memory_space<vmem>>, vector<16x128xf32>
    %c0_9 = arith.constant 0 : index
    %c0_10 = arith.constant 0 : index
    %5 = vector.load %arg5[%c0_9, %c0_10] : memref<1x128xf32, #tpu.memory_space<vmem>>, vector<1x128xf32>
    %c0_11 = arith.constant 0 : index
    %c0_12 = arith.constant 0 : index
    %6 = vector.load %arg6[%c0_11, %c0_12] : memref<128x32xf32, #tpu.memory_space<vmem>>, vector<128x32xf32>
    %cst = arith.constant dense<0.000000e+00> : vector<16x128xf32>
    %7 = tpu.matmul %0, %4, %cst {dimension_numbers = #tpu.dot_dimension_numbers<[1], [0], [0], [1], [0, 0, 1, 1], [], []>} : vector<16x16xf32>, vector<16x128xf32>, vector<16x128xf32> -> vector<16x128xf32>
    %8 = vector.broadcast %5 : vector<1x128xf32> to vector<16x128xf32>
    %9 = arith.addf %7, %8 : vector<16x128xf32>
    %cst_13 = arith.constant dense<0.000000e+00> : vector<16x128xf32>
    %10 = tpu.matmul %0, %2, %cst_13 {dimension_numbers = #tpu.dot_dimension_numbers<[1], [0], [0], [1], [0, 0, 1, 1], [], []>} : vector<16x16xf32>, vector<16x128xf32>, vector<16x128xf32> -> vector<16x128xf32>
    %cst_14 = arith.constant dense<0.000000e+00> : vector<16x128xf32>
    %11 = tpu.matmul %1, %10, %cst_14 {dimension_numbers = #tpu.dot_dimension_numbers<[1], [0], [0], [1], [0, 0, 1, 1], [], []>} : vector<16x16xf32>, vector<16x128xf32>, vector<16x128xf32> -> vector<16x128xf32>
    %12 = arith.addf %11, %9 : vector<16x128xf32>
    %cst_15 = arith.constant 0.000000e+00 : f32
    %13 = vector.broadcast %cst_15 : f32 to vector<16x128xf32>
    %14 = arith.maximumf %12, %13 : vector<16x128xf32>
    %cst_16 = arith.constant dense<0.000000e+00> : vector<16x128xf32>
    %15 = tpu.matmul %14, %3, %cst_16 {dimension_numbers = #tpu.dot_dimension_numbers<[1], [0], [0], [1], [0, 0, 1, 1], [], []>} : vector<16x128xf32>, vector<128x128xf32>, vector<16x128xf32> -> vector<16x128xf32>
    %cst_17 = arith.constant dense<0.000000e+00> : vector<16x128xf32>
    %16 = tpu.matmul %1, %15, %cst_17 {dimension_numbers = #tpu.dot_dimension_numbers<[1], [0], [0], [1], [0, 0, 1, 1], [], []>} : vector<16x16xf32>, vector<16x128xf32>, vector<16x128xf32> -> vector<16x128xf32>
    %17 = arith.addf %16, %9 : vector<16x128xf32>
    %cst_18 = arith.constant 0.000000e+00 : f32
    %18 = vector.broadcast %cst_18 : f32 to vector<16x128xf32>
    %19 = arith.maximumf %17, %18 : vector<16x128xf32>
    %cst_19 = arith.constant dense<0.000000e+00> : vector<16x32xf32>
    %20 = tpu.matmul %19, %6, %cst_19 {dimension_numbers = #tpu.dot_dimension_numbers<[1], [0], [0], [1], [0, 0, 1, 1], [], []>} : vector<16x128xf32>, vector<128x32xf32>, vector<16x32xf32> -> vector<16x32xf32>
    %c0_20 = arith.constant 0 : index
    %c0_21 = arith.constant 0 : index
    %21 = vector.load %arg7[%c0_20, %c0_21] : memref<32x128xf32, #tpu.memory_space<vmem>>, vector<32x128xf32>
    %c0_22 = arith.constant 0 : index
    %c0_23 = arith.constant 0 : index
    %22 = vector.load %arg8[%c0_22, %c0_23] : memref<128x128xf32, #tpu.memory_space<vmem>>, vector<128x128xf32>
    %c0_24 = arith.constant 0 : index
    %c0_25 = arith.constant 0 : index
    %23 = vector.load %arg9[%c0_24, %c0_25] : memref<32x128xf32, #tpu.memory_space<vmem>>, vector<32x128xf32>
    %c0_26 = arith.constant 0 : index
    %c0_27 = arith.constant 0 : index
    %24 = vector.load %arg10[%c0_26, %c0_27] : memref<1x128xf32, #tpu.memory_space<vmem>>, vector<1x128xf32>
    %c0_28 = arith.constant 0 : index
    %c0_29 = arith.constant 0 : index
    %25 = vector.load %arg11[%c0_28, %c0_29] : memref<128x8xf32, #tpu.memory_space<vmem>>, vector<128x8xf32>
    %cst_30 = arith.constant dense<0.000000e+00> : vector<16x128xf32>
    %26 = tpu.matmul %20, %23, %cst_30 {dimension_numbers = #tpu.dot_dimension_numbers<[1], [0], [0], [1], [0, 0, 1, 1], [], []>} : vector<16x32xf32>, vector<32x128xf32>, vector<16x128xf32> -> vector<16x128xf32>
    %27 = vector.broadcast %24 : vector<1x128xf32> to vector<16x128xf32>
    %28 = arith.addf %26, %27 : vector<16x128xf32>
    %cst_31 = arith.constant dense<0.000000e+00> : vector<16x128xf32>
    %29 = tpu.matmul %20, %21, %cst_31 {dimension_numbers = #tpu.dot_dimension_numbers<[1], [0], [0], [1], [0, 0, 1, 1], [], []>} : vector<16x32xf32>, vector<32x128xf32>, vector<16x128xf32> -> vector<16x128xf32>
    %cst_32 = arith.constant dense<0.000000e+00> : vector<16x128xf32>
    %30 = tpu.matmul %1, %29, %cst_32 {dimension_numbers = #tpu.dot_dimension_numbers<[1], [0], [0], [1], [0, 0, 1, 1], [], []>} : vector<16x16xf32>, vector<16x128xf32>, vector<16x128xf32> -> vector<16x128xf32>
    %31 = arith.addf %30, %28 : vector<16x128xf32>
    %cst_33 = arith.constant dense<0.000000e+00> : vector<16x128xf32>
    %32 = tpu.matmul %31, %22, %cst_33 {dimension_numbers = #tpu.dot_dimension_numbers<[1], [0], [0], [1], [0, 0, 1, 1], [], []>} : vector<16x128xf32>, vector<128x128xf32>, vector<16x128xf32> -> vector<16x128xf32>
    %cst_34 = arith.constant dense<0.000000e+00> : vector<16x128xf32>
    %33 = tpu.matmul %1, %32, %cst_34 {dimension_numbers = #tpu.dot_dimension_numbers<[1], [0], [0], [1], [0, 0, 1, 1], [], []>} : vector<16x16xf32>, vector<16x128xf32>, vector<16x128xf32> -> vector<16x128xf32>
    %34 = arith.addf %33, %28 : vector<16x128xf32>
    %cst_35 = arith.constant dense<0.000000e+00> : vector<16x8xf32>
    %35 = tpu.matmul %34, %25, %cst_35 {dimension_numbers = #tpu.dot_dimension_numbers<[1], [0], [0], [1], [0, 0, 1, 1], [], []>} : vector<16x128xf32>, vector<128x8xf32>, vector<16x8xf32> -> vector<16x8xf32>
    %cst_36 = arith.constant dense<0xFF800000> : vector<16xf32>
    %36 = vector.multi_reduction <maximumf>, %35, %cst_36 [1] : vector<16x8xf32> to vector<16xf32>
    %37 = vector.shape_cast %36 : vector<16xf32> to vector<16x1xf32>
    %38 = vector.broadcast %37 : vector<16x1xf32> to vector<16x8xf32>
    %39 = arith.subf %35, %38 : vector<16x8xf32>
    %40 = math.exp %39 : vector<16x8xf32>
    %cst_37 = arith.constant dense<0.000000e+00> : vector<16xf32>
    %41 = vector.multi_reduction <add>, %40, %cst_37 [1] : vector<16x8xf32> to vector<16xf32>
    %42 = vector.shape_cast %41 : vector<16xf32> to vector<16x1xf32>
    %43 = math.log %42 : vector<16x1xf32>
    %44 = arith.addf %43, %37 : vector<16x1xf32>
    %45 = vector.broadcast %44 : vector<16x1xf32> to vector<16x8xf32>
    %46 = arith.subf %35, %45 : vector<16x8xf32>
    %c0_38 = arith.constant 0 : index
    %c0_39 = arith.constant 0 : index
    %47 = vector.load %arg12[%c0_38, %c0_39] : memref<16x8xf32, #tpu.memory_space<vmem>>, vector<16x8xf32>
    tpu.vector_store %arg12[%c0_38, %c0_39], %46 {strides = array<i32>} : memref<16x8xf32, #tpu.memory_space<vmem>>, vector<16x8xf32>,
    return
  }
}

</mosaic_0001>

<bundles_post_ra>
// kernel: tpu_custom_call.1
= control target key start
LH: loop header
LB: loop body
LE: loop exit
PB: predicated region body
PF: predicated region fallthrough
CT: control target
= control target key end

     0   :  { %17 = vsyncpa [#allocation3], 0  ;;  %s1978_s0 = inlined_call_operand.hbm [shape: f32[16,16], index: 0, kind: input, shape index: {}]   ;;  %s1979_s1 = inlined_call_operand.hbm [shape: f32[16,16], index: 1, kind: input, shape index: {}]   ;;  %s1980_s2 = inlined_call_operand.hbm [shape: f32[16,128], index: 2, kind: input, shape index: {}]   ;;  %s1981_s3 = inlined_call_operand.vmem [shape: f32[128,128], index: 3, kind: input, shape index: {}]   ;;  %s1982_s4 = inlined_call_operand.hbm [shape: f32[16,128], index: 4, kind: input, shape index: {}]   ;;  %s1983_s5 = inlined_call_operand.vmem [shape: f32[1,128], index: 5, kind: input, shape index: {}]   ;;  %s1984_s6 = inlined_call_operand.vmem [shape: f32[128,32], index: 6, kind: input, shape index: {}]   ;;  %s1985_s7 = inlined_call_operand.vmem [shape: f32[32,128], index: 7, kind: input, shape index: {}]   ;;  %s1986_s8 = inlined_call_operand.vmem [shape: f32[128,128], index: 8, kind: input, shape index: {}]   ;;  %s1987_s9 = inlined_call_operand.hbm [shape: f32[32,128], index: 9, kind: input, shape index: {}]   ;;  %s1988_s10 = inlined_call_operand.vmem [shape: f32[1,128], index: 10, kind: input, shape index: {}]   ;;  %s1989_s11 = inlined_call_operand.vmem [shape: f32[128,8], index: 11, kind: input, shape index: {}]   ;;  %s1990_s12 = inlined_call_operand.vmem [shape: f32[16,8], index: 12, kind: output, shape index: {}]  }
   0x1   :  { %18 = vsyncpa [#allocation5], 0 }
   0x2   :  { %19 = vsyncpa [#allocation8], 0  ;;  %s1614_s21 = smov [#allocation4]   ;;  %s1615_s23 = smov [#allocation7]  }
   0x3   :  { %s37_s22 = sshll.u32 %s1614_s21, 4  ;;  %s63_s24 = sshll.u32 %s1615_s23, 4  ;;  %s38_s22 = int_to_ptr.vmem [resolvable:$true] %s37_s22  ;;  %s64_s24 = int_to_ptr.vmem [resolvable:$true] %s63_s24 }
   0x4   :  { %s1516_s25 = scalar_lea.vmem %s38_s22, 256  ;;  %p1521_p1 = scmp.lt.s32.totalorder %s38_s22, %s38_s22 }
   0x5   :  { %p1517_p0 = scmp.ne.s32.totalorder %s38_s22, %s1516_s25  ;;  %p1522_p2 = scmp.lt.s32.totalorder %s1516_s25, %s1516_s25 }
   0x7   :  { %p1523_p3 = por %p1522_p2, %p1521_p1 }
   0x9   :  { %p1524_p4 = pnand %p1523_p3, %p1517_p0 }
   0xb   :  { %1527 = shalt.err (!%p1524_p4)
}
   0xc   :  { %s1616_s26 = smov 128   ;;  %s1617_s27 = smov 8  }
   0xd   :  { %43 = dma.hbm_to_vmem [thread:$0]  %s1979_s1, 256, %s38_s22, [#allocation5], %s1616_s26, %s1616_s26, %s1617_s27  }
   0xe   :  { %s1536_s30 = scalar_lea.vmem %s64_s24, 256  ;;  %p1541_p6 = scmp.lt.s32.totalorder %s64_s24, %s64_s24 }
   0xf   :  { %p1537_p5 = scmp.ne.s32.totalorder %s64_s24, %s1536_s30  ;;  %p1542_p7 = scmp.lt.s32.totalorder %s1536_s30, %s1536_s30 }
  0x11   :  { %p1543_p8 = por %p1542_p7, %p1541_p6 }
  0x13   :  { %p1544_p9 = pnand %p1543_p8, %p1537_p5 }
  0x15   :  { %1547 = shalt.err (!%p1544_p9)
}
  0x16   :  { %69 = dma.hbm_to_vmem [thread:$0]  %s1982_s4, 256, %s64_s24, [#allocation8], %s1616_s26, %s1616_s26, %s1617_s27  }
  0x17   :  { %s1618_s15 = smov [#allocation2]   ;;  %s1619_s17 = smov [#allocation6]  }
  0x18   :  { %s25_s16 = sshll.u32 %s1618_s15, 4  ;;  %s49_s18 = sshll.u32 %s1619_s17, 4  ;;  %s26_s16 = int_to_ptr.vmem [resolvable:$true] %s25_s16  ;;  %s50_s18 = int_to_ptr.vmem [resolvable:$true] %s49_s18 }
  0x19   :  { %s1556_s1 = scalar_lea.vmem %s26_s16, 256  ;;  %p1561_p11 = scmp.lt.s32.totalorder %s26_s16, %s26_s16 }
  0x1a   :  { %p1557_p10 = scmp.ne.s32.totalorder %s26_s16, %s1556_s1  ;;  %p1562_p12 = scmp.lt.s32.totalorder %s1556_s1, %s1556_s1 }
  0x1c   :  { %p1563_p13 = por %p1562_p12, %p1561_p11 }
  0x1e   :  { %p1564_p0 = pnand %p1563_p13, %p1557_p10 }
  0x20   :  { %1567 = shalt.err (!%p1564_p0)
}
  0x21   :  { %31 = dma.hbm_to_vmem [thread:$0]  %s1978_s0, 256, %s26_s16, [#allocation3], %s1616_s26, %s1616_s26, %s1617_s27  }
  0x22   :  { %s1576_s4 = scalar_lea.vmem %s50_s18, 256  ;;  %p1581_p2 = scmp.lt.s32.totalorder %s50_s18, %s50_s18 }
  0x23   :  { %p1577_p1 = scmp.ne.s32.totalorder %s50_s18, %s1576_s4  ;;  %p1582_p3 = scmp.lt.s32.totalorder %s1576_s4, %s1576_s4 }
  0x25   :  { %p1583_p4 = por %p1582_p3, %p1581_p2 }
  0x27   :  { %p1584_p5 = pnand %p1583_p4, %p1577_p1 }
  0x29   :  { %1587 = shalt.err (!%p1584_p5)
}
  0x2a   :  { %55 = dma.hbm_to_vmem [thread:$0]  %s1980_s2, 256, %s50_s18, [#allocation5], %s1616_s26, %s1616_s26, %s1617_s27  }
  0x2b   :  { %s1620_s23 = smov [#allocation9]  }
  0x2c   :  { %s83_s24 = sshll.u32 %s1620_s23, 4  ;;  %s84_s24 = int_to_ptr.vmem [resolvable:$true] %s83_s24 }
  0x2d   :  { %s1596_s25 = scalar_lea.vmem %s84_s24, 512  ;;  %p1601_p7 = scmp.lt.s32.totalorder %s84_s24, %s84_s24 }
  0x2e   :  { %p1597_p6 = scmp.ne.s32.totalorder %s84_s24, %s1596_s25  ;;  %p1602_p8 = scmp.lt.s32.totalorder %s1596_s25, %s1596_s25 }
  0x30   :  { %p1603_p9 = por %p1602_p8, %p1601_p7 }
  0x32   :  { %p1604_p10 = pnand %p1603_p9, %p1597_p6 }
  0x34   :  { %1607 = shalt.err (!%p1604_p10)
}
  0x35   :  { %89 = dma.hbm_to_vmem [thread:$0]  %s1987_s9, 512, %s84_s24, [#allocation8], %s1616_s26, %s1616_s26, %s1617_s27  }
  0x36   :  { %1608 = dma.done.wait [#allocation3], 256  }
  0x37   :  { %1609 = vsyncadd [#allocation3], 4294967040 }
  0x38   :  { %1610 = dma.done.wait [#allocation5], 512  }
  0x39   :  { %1611 = vsyncadd [#allocation5], 4294966784 }
  0x3a   :  { %1612 = dma.done.wait [#allocation8], 768  }
  0x3b   :  { %1613 = vsyncadd [#allocation8], 4294966528  ;;  %vm156_vm0 = vcmask 130048   ;;  %v132_v0 = vld [vmem:[#allocation7 + $0x8] sm:$0xff]  ;;  %v131_v1 = vld [vmem:[#allocation7] sm:$0xff]  ;;  %vm670_vm1 = vcmask 261120  }
  0x3c   :  { %v109_v2 = vld [vmem:[#allocation2] sm:$0xff]  ;;  %1289 = vmatprep.subr.mxu1 %v132_v0  ;;  %v110_v3 = vld [vmem:[#allocation2 + $0x8] sm:$0xff]  ;;  %v1720_v6 = vld [vmem:[#allocation4] sm:$0xff]  ;;  %vm1127_vm2 = vcmask 64512  }
  0x3d   :  { %1293 = vmatprep.mubr.msk.f32.mxu1 %vm156_vm0, %v109_v2  ;;  %1290 = vmatpush3.msra.mxu1 %v132_v0  ;;  %v114_v4 = vld [vmem:[#allocation6 + $0x8] sm:$0xff]  ;;  %v113_v5 = vld [vmem:[#allocation6] sm:$0xff]  ;;  %v130_v7 = vld [vmem:[%s1981_s3 + $0x78] sm:$0xff] }
  0x3e   :  { %1291 = vmatprep.subr.mxu1 %v131_v1  ;;  %1307 = vmatprep.mubr.msk.f32.mxu0 %vm156_vm0, %v1720_v6  ;;  %v129_v8 = vld [vmem:[%s1981_s3 + $0x70] sm:$0xff]  ;;  %v128_v9 = vld [vmem:[%s1981_s3 + $0x68] sm:$0xff]  ;;  %v127_v10 = vld [vmem:[%s1981_s3 + $0x60] sm:$0xff] }
  0x3f   :  { %1292 = vmatpush3.msra.mxu1 %v131_v1  ;;  %v126_v11 = vld [vmem:[%s1981_s3 + $0x58] sm:$0xff]  ;;  %v125_v12 = vld [vmem:[%s1981_s3 + $0x50] sm:$0xff]  ;;  %v124_v13 = vld [vmem:[%s1981_s3 + $0x48] sm:$0xff] }
  0x40   :  { %1294 = vmatmul.mubr.msk.f32.vlgmr.msra.gmra.mxu1 %vm156_vm0, %v110_v3  ;;  %1296 = vmatprep.subr.mxu1 %v114_v4  ;;  %v123_v14 = vld [vmem:[%s1981_s3 + $0x40] sm:$0xff]  ;;  %v122_v15 = vld [vmem:[%s1981_s3 + $0x38] sm:$0xff]  ;;  %v121_v16 = vld [vmem:[%s1981_s3 + $0x30] sm:$0xff] }
  0x41   :  { %1297 = vmatpush3.msra.mxu1 %v114_v4  ;;  %1300 = vmatprep.mubr.msk.f32.mxu1 %vm156_vm0, %v109_v2  ;;  %v120_v17 = vld [vmem:[%s1981_s3 + $0x28] sm:$0xff]  ;;  %v119_v18 = vld [vmem:[%s1981_s3 + $0x20] sm:$0xff]  ;;  %v1760_v23 = vld [vmem:[#allocation4 + $0x8] sm:$0xff] }
  0x42   :  { %1298 = vmatprep.subr.mxu1 %v113_v5  ;;  %v118_v24 = vld [vmem:[%s1981_s3 + $0x18] sm:$0xff]  ;;  %v117_v25 = vld [vmem:[%s1981_s3 + $0x10] sm:$0xff]  ;;  %v116_v26 = vld [vmem:[%s1981_s3 + $0x8] sm:$0xff] }
  0x43   :  { %1299 = vmatpush3.msra.mxu1 %v113_v5  ;;  %v115_v27 = vld [vmem:[%s1981_s3] sm:$0xff]  ;;  %v149_v39 = vld [vmem:[%s1984_s6 + $0x78] sm:$0xff]  ;;  %v148_v40 = vld [vmem:[%s1984_s6 + $0x70] sm:$0xff] }
  0x44   :  { %1301 = vmatmul.mubr.msk.f32.vlgmr.msra.gmra.mxu1 %vm156_vm0, %v110_v3  ;;  %1310 = vmatprep.subr.mxu1 %v130_v7  ;;  %v1163_v28 = vld [vmem:[%s1983_s5] ss:$0 sm:$0xff]  ;;  %v147_v41 = vld [vmem:[%s1984_s6 + $0x68] sm:$0xff]  ;;  %v145_v43 = vld [vmem:[%s1984_s6 + $0x58] sm:$0xff] }
  0x45   :  { %1311 = vmatpush3.msra.mxu1 %v130_v7  ;;  %v146_v42 = vld [vmem:[%s1984_s6 + $0x60] sm:$0xff]  ;;  %v144_v44 = vld [vmem:[%s1984_s6 + $0x50] sm:$0xff]  ;;  %v143_v45 = vld [vmem:[%s1984_s6 + $0x48] sm:$0xff] }
  0x46   :  { %1312 = vmatprep.subr.mxu1 %v129_v8  ;;  %v142_v46 = vld [vmem:[%s1984_s6 + $0x40] sm:$0xff]  ;;  %v141_v47 = vld [vmem:[%s1984_s6 + $0x38] sm:$0xff]  ;;  %v140_v48 = vld [vmem:[%s1984_s6 + $0x30] sm:$0xff] }
  0x47   :  { %1313 = vmatpush3.msra.mxu1 %v129_v8  ;;  %v139_v49 = vld [vmem:[%s1984_s6 + $0x28] sm:$0xff]  ;;  %v138_v50 = vld [vmem:[%s1984_s6 + $0x20] sm:$0xff]  ;;  %v137_v51 = vld [vmem:[%s1984_s6 + $0x18] sm:$0xff] }
  0x48   :  { %1314 = vmatprep.subr.mxu1 %v128_v9  ;;  %v136_v52 = vld [vmem:[%s1984_s6 + $0x10] sm:$0xff]  ;;  %v135_v53 = vld [vmem:[%s1984_s6 + $0x8] sm:$0xff]  ;;  %v134_v54 = vld [vmem:[%s1984_s6] sm:$0xff] }
  0x49   :  { %1315 = vmatpush3.msra.mxu1 %v128_v9  ;;  %v646_v55 = vld [vmem:[#allocation9 + $0x18] sm:$0xff]  ;;  %v645_v57 = vld [vmem:[#allocation9 + $0x10] sm:$0xff]  ;;  %v644_v1 = vld [vmem:[#allocation9 + $0x8] sm:$0xff] }
  0x4a   :  { %1316 = vmatprep.subr.mxu1 %v127_v10  ;;  %v626_v56 = vld [vmem:[%s1985_s7 + $0x18] sm:$0xff]  ;;  %v625_v0 = vld [vmem:[%s1985_s7 + $0x10] sm:$0xff]  ;;  %v624_v2 = vld [vmem:[%s1985_s7 + $0x8] sm:$0xff] }
  0x4b   :  { %1317 = vmatpush3.msra.mxu1 %v127_v10  ;;  %v643_v3 = vld [vmem:[#allocation9] sm:$0xff]  ;;  %v642_v10 = vld [vmem:[%s1986_s8 + $0x78] sm:$0xff] }
  0x4c   :  { %1318 = vmatprep.subr.mxu1 %v126_v11  ;;  %v623_v4 = vld [vmem:[%s1985_s7] sm:$0xff] }
  0x4d   :  { %1319 = vmatpush3.msra.mxu1 %v126_v11  ;;  %v641_v11 = vld [vmem:[%s1986_s8 + $0x70] sm:$0xff] }
  0x4e   :  { %1320 = vmatprep.subr.mxu1 %v125_v12 }
  0x4f   :  { %1321 = vmatpush3.msra.mxu1 %v125_v12  ;;  %v639_v12 = vld [vmem:[%s1986_s8 + $0x60] sm:$0xff] }
  0x50   :  { %1322 = vmatprep.subr.mxu1 %v124_v13 }
  0x51   :  { %1323 = vmatpush3.msra.mxu1 %v124_v13  ;;  %v638_v13 = vld [vmem:[%s1986_s8 + $0x58] sm:$0xff] }
  0x52   :  { %1324 = vmatprep.subr.mxu1 %v123_v14 }
  0x53   :  { %1325 = vmatpush3.msra.mxu1 %v123_v14  ;;  %v637_v14 = vld [vmem:[%s1986_s8 + $0x50] sm:$0xff] }
  0x54   :  { %1326 = vmatprep.subr.mxu1 %v122_v15 }
  0x55   :  { %1327 = vmatpush3.msra.mxu1 %v122_v15  ;;  %v636_v15 = vld [vmem:[%s1986_s8 + $0x48] sm:$0xff] }
  0x56   :  { %1328 = vmatprep.subr.mxu1 %v121_v16 }
  0x57   :  { %1329 = vmatpush3.msra.mxu1 %v121_v16  ;;  %v635_v16 = vld [vmem:[%s1986_s8 + $0x40] sm:$0xff] }
  0x58   :  { %1330 = vmatprep.subr.mxu1 %v120_v17 }
  0x59   :  { %1331 = vmatpush3.msra.mxu1 %v120_v17  ;;  %v634_v17 = vld [vmem:[%s1986_s8 + $0x38] sm:$0xff] }
  0x5a   :  { %1332 = vmatprep.subr.mxu1 %v119_v18 }
  0x5b   :  { %1333 = vmatpush3.msra.mxu1 %v119_v18  ;;  %v633_v18 = vld [vmem:[%s1986_s8 + $0x30] sm:$0xff] }
  0x5c   :  { %1334 = vmatprep.subr.mxu1 %v118_v24 }
  0x5d   :  { %1335 = vmatpush3.msra.mxu1 %v118_v24  ;;  %v628_v24 = vld [vmem:[%s1986_s8 + $0x8] sm:$0xff] }
  0x5e   :  { %1336 = vmatprep.subr.mxu1 %v117_v25 }
  0x5f   :  { %1337 = vmatpush3.msra.mxu1 %v117_v25  ;;  %v627_v25 = vld [vmem:[%s1986_s8] sm:$0xff] }
  0x60   :  { %1338 = vmatprep.subr.mxu1 %v116_v26 }
  0x61   :  { %1339 = vmatpush3.msra.mxu1 %v116_v26 }
  0x62   :  { %1340 = vmatprep.subr.mxu1 %v115_v27 }
  0x63   :  { %1341 = vmatpush3.msra.mxu1 %v115_v27 }
  0x64   :  { %1387 = vmatprep.subr.mxu1 %v646_v55 }
 0x100   :  { %v1295_v19 = vpop.f32.mrf.mxu1 }
 0x101   :  { %v1781_v29 = vadd.f32 %v1295_v19, %v1163_v28  ;;  %v632_v19 = vld [vmem:[%s1986_s8 + $0x28] sm:$0xff] }
 0x102   :  { %v229_v20 = vpop.f32.mrf.mxu1 }
 0x103   :  { %v1783_v31 = vadd.f32 %v1163_v28, %v229_v20  ;;  %v631_v20 = vld [vmem:[%s1986_s8 + $0x20] sm:$0xff] }
 0x104   :  { %v1302_v21 = vpop.f32.mrf.mxu1  ;;  %v1172_v28 = vld [vmem:[%s1988_s10] ss:$0 sm:$0xff] }
 0x105   :  { %1303 = vmatprep.subr.mxu0 %v1302_v21 }
 0x106   :  { %v304_v22 = vpop.f32.mrf.mxu1  ;;  %1304 = vmatpush3.msra.mxu0 %v1302_v21  ;;  %v630_v21 = vld [vmem:[%s1986_s8 + $0x18] sm:$0xff] }
 0x107   :  { %1305 = vmatprep.subr.mxu0 %v304_v22 }
 0x108   :  { %1306 = vmatpush3.msra.mxu0 %v304_v22  ;;  %v629_v22 = vld [vmem:[%s1986_s8 + $0x10] sm:$0xff] }
 0x109   :  { %1308 = vmatmul.mubr.msk.f32.vlgmr.msra.gmra.mxu0 %vm156_vm0, %v1760_v23 }
 0x10a   :  { %1349 = vmatprep.mubr.msk.f32.mxu0 %vm156_vm0, %v1720_v6 }
 0x1c9   :  { %v1309_v30 = vpop.f32.mrf.mxu0 }
 0x1ca   :  { %v391_v32 = vadd.f32 %v1309_v30, %v1781_v29 }
 0x1cb   :  { %v385_v33 = vpop.f32.mrf.mxu0 }
 0x1cc   :  { %v386_v34 = vadd.f32 %v385_v33, %v1783_v31  ;;  %v395_v36 = vmax.f32 %v391_v32, 0.0 }
 0x1ce   :  { %v394_v35 = vmax.f32 %v386_v34, 0.0 }
 0x1d0   :  { %1342 = vmatprep.mubr.f32.mxu1 %v394_v35 }
 0x1d1   :  { %1343 = vmatmul.mubr.f32.vlgmr.msra.gmra.mxu1 %v395_v36 }
 0x1d2   :  { %1388 = vmatpush3.msra.mxu1 %v646_v55 }
 0x1d3   :  { %1389 = vmatprep.subr.mxu1 %v645_v57 }
 0x1d4   :  { %1390 = vmatpush3.msra.mxu1 %v645_v57 }
 0x1d5   :  { %1391 = vmatprep.subr.mxu1 %v644_v1 }
 0x1d6   :  { %1392 = vmatpush3.msra.mxu1 %v644_v1 }
 0x1d7   :  { %1393 = vmatprep.subr.mxu1 %v643_v3 }
 0x1d8   :  { %1394 = vmatpush3.msra.mxu1 %v643_v3 }
 0x291   :  { %v1344_v37 = vpop.f32.mrf.mxu1 }
 0x292   :  { %1345 = vmatprep.subr.mxu0 %v1344_v37 }
 0x293   :  { %v462_v38 = vpop.f32.mrf.mxu1  ;;  %1346 = vmatpush3.msra.mxu0 %v1344_v37  ;;  %v663_v37 = vld [vmem:[%s1989_s11 + $0x78] sm:$0xff] }
 0x294   :  { %1347 = vmatprep.subr.mxu0 %v462_v38 }
 0x295   :  { %1348 = vmatpush3.msra.mxu0 %v462_v38  ;;  %v662_v38 = vld [vmem:[%s1989_s11 + $0x70] sm:$0xff] }
 0x296   :  { %1350 = vmatmul.mubr.msk.f32.vlgmr.msra.gmra.mxu0 %vm156_vm0, %v1760_v23  ;;  %1352 = vmatprep.subr.mxu0 %v149_v39 }
 0x297   :  { %1353 = vmatpush3.msra.mxu0 %v149_v39  ;;  %v661_v39 = vld [vmem:[%s1989_s11 + $0x68] sm:$0xff] }
 0x298   :  { %1354 = vmatprep.subr.mxu0 %v148_v40 }
 0x299   :  { %1355 = vmatpush3.msra.mxu0 %v148_v40  ;;  %v660_v40 = vld [vmem:[%s1989_s11 + $0x60] sm:$0xff] }
 0x29a   :  { %1356 = vmatprep.subr.mxu0 %v147_v41 }
 0x29b   :  { %1357 = vmatpush3.msra.mxu0 %v147_v41  ;;  %v659_v41 = vld [vmem:[%s1989_s11 + $0x58] sm:$0xff] }
 0x29c   :  { %1358 = vmatprep.subr.mxu0 %v146_v42 }
 0x29d   :  { %1359 = vmatpush3.msra.mxu0 %v146_v42  ;;  %v657_v42 = vld [vmem:[%s1989_s11 + $0x48] sm:$0xff] }
 0x29e   :  { %1360 = vmatprep.subr.mxu0 %v145_v43 }
 0x29f   :  { %1361 = vmatpush3.msra.mxu0 %v145_v43  ;;  %v656_v43 = vld [vmem:[%s1989_s11 + $0x40] sm:$0xff] }
 0x2a0   :  { %1362 = vmatprep.subr.mxu0 %v144_v44 }
 0x2a1   :  { %1363 = vmatpush3.msra.mxu0 %v144_v44  ;;  %v655_v44 = vld [vmem:[%s1989_s11 + $0x38] sm:$0xff] }
 0x2a2   :  { %1364 = vmatprep.subr.mxu0 %v143_v45 }
 0x2a3   :  { %1365 = vmatpush3.msra.mxu0 %v143_v45  ;;  %v654_v45 = vld [vmem:[%s1989_s11 + $0x30] sm:$0xff] }
 0x2a4   :  { %1366 = vmatprep.subr.mxu0 %v142_v46 }
 0x2a5   :  { %1367 = vmatpush3.msra.mxu0 %v142_v46  ;;  %v653_v46 = vld [vmem:[%s1989_s11 + $0x28] sm:$0xff] }
 0x2a6   :  { %1368 = vmatprep.subr.mxu0 %v141_v47 }
 0x2a7   :  { %1369 = vmatpush3.msra.mxu0 %v141_v47  ;;  %v652_v47 = vld [vmem:[%s1989_s11 + $0x20] sm:$0xff] }
 0x2a8   :  { %1370 = vmatprep.subr.mxu0 %v140_v48 }
 0x2a9   :  { %1371 = vmatpush3.msra.mxu0 %v140_v48  ;;  %v651_v48 = vld [vmem:[%s1989_s11 + $0x18] sm:$0xff] }
 0x2aa   :  { %1372 = vmatprep.subr.mxu0 %v139_v49 }
 0x2ab   :  { %1373 = vmatpush3.msra.mxu0 %v139_v49  ;;  %v650_v49 = vld [vmem:[%s1989_s11 + $0x10] sm:$0xff] }
 0x2ac   :  { %1374 = vmatprep.subr.mxu0 %v138_v50 }
 0x2ad   :  { %1375 = vmatpush3.msra.mxu0 %v138_v50  ;;  %v649_v50 = vld [vmem:[%s1989_s11 + $0x8] sm:$0xff] }
 0x2ae   :  { %1376 = vmatprep.subr.mxu0 %v137_v51 }
 0x2af   :  { %1377 = vmatpush3.msra.mxu0 %v137_v51  ;;  %v648_v51 = vld [vmem:[%s1989_s11] sm:$0xff] }
 0x2b0   :  { %1378 = vmatprep.subr.mxu0 %v136_v52 }
 0x2b1   :  { %1379 = vmatpush3.msra.mxu0 %v136_v52 }
 0x2b2   :  { %1380 = vmatprep.subr.mxu0 %v135_v53 }
 0x2b3   :  { %1381 = vmatpush3.msra.mxu0 %v135_v53 }
 0x2b4   :  { %1382 = vmatprep.subr.mxu0 %v134_v54 }
 0x2b5   :  { %1383 = vmatpush3.msra.mxu0 %v134_v54 }
 0x2b6   :  { %1398 = vmatprep.subr.mxu0 %v626_v56 }
 0x356   :  { %v1351_v58 = vpop.f32.mrf.mxu0 }
 0x357   :  { %v543_v59 = vadd.f32 %v1351_v58, %v1781_v29 }
 0x358   :  { %v537_v60 = vpop.f32.mrf.mxu0 }
 0x359   :  { %v538_v61 = vadd.f32 %v537_v60, %v1783_v31  ;;  %v547_v63 = vmax.f32 %v543_v59, 0.0 }
 0x35b   :  { %v546_v62 = vmax.f32 %v538_v61, 0.0 }
 0x35d   :  { %1384 = vmatprep.mubr.f32.mxu0 %v546_v62 }
 0x35e   :  { %1385 = vmatmul.mubr.f32.vlgmr.msra.gmra.mxu0 %v547_v63 }
 0x35f   :  { %1399 = vmatpush3.msra.mxu0 %v626_v56 }
 0x360   :  { %1400 = vmatprep.subr.mxu0 %v625_v0 }
 0x361   :  { %1401 = vmatpush3.msra.mxu0 %v625_v0 }
 0x362   :  { %1402 = vmatprep.subr.mxu0 %v624_v2 }
 0x363   :  { %1403 = vmatpush3.msra.mxu0 %v624_v2 }
 0x364   :  { %1404 = vmatprep.subr.mxu0 %v623_v4 }
 0x365   :  { %1405 = vmatpush3.msra.mxu0 %v623_v4 }
 0x41e   :  { %v1386_v5 = vpop.f32.mrf.mxu0 }
 0x420   :  { %v614_v7 = vpop.f32.mrf.mxu0 }
 0x421   :  { %1395 = vmatprep.mubr.msk.f32.mxu1 %vm670_vm1, %v614_v7  ;;  %1406 = vmatprep.mubr.msk.f32.mxu0 %vm670_vm1, %v614_v7 }
 0x422   :  { %1396 = vmatmul.mubr.msk.f32.vlgmr.msra.gmra.mxu1 %vm670_vm1, %v1386_v5  ;;  %1407 = vmatmul.mubr.msk.f32.vlgmr.msra.gmra.mxu0 %vm670_vm1, %v1386_v5 }
 0x423   :  { %1413 = vmatprep.mubr.msk.f32.mxu1 %vm156_vm0, %v1720_v6  ;;  %1455 = vmatprep.mubr.msk.f32.mxu0 %vm156_vm0, %v1720_v6  ;;  %v640_v6 = vld [vmem:[%s1986_s8 + $0x68] sm:$0xff] }
 0x4e2   :  { %v1408_v8 = vpop.f32.mrf.mxu0  ;;  %v1397_v26 = vpop.f32.mrf.mxu1 }
 0x4e3   :  { %1409 = vmatprep.subr.mxu1 %v1408_v8  ;;  %v1910_v31 = vadd.f32 %v1397_v26, %v1172_v28 }
 0x4e4   :  { %v818_v9 = vpop.f32.mrf.mxu0  ;;  %1410 = vmatpush3.msra.mxu1 %v1408_v8  ;;  %v743_v27 = vpop.f32.mrf.mxu1 }
 0x4e5   :  { %1411 = vmatprep.subr.mxu1 %v818_v9  ;;  %v1908_v30 = vadd.f32 %v1172_v28, %v743_v27 }
 0x4e6   :  { %1412 = vmatpush3.msra.mxu1 %v818_v9 }
 0x4e7   :  { %1414 = vmatmul.mubr.msk.f32.vlgmr.msra.gmra.mxu1 %vm156_vm0, %v1760_v23  ;;  %1416 = vmatprep.subr.mxu1 %v642_v10 }
 0x4e8   :  { %1417 = vmatpush3.msra.mxu1 %v642_v10 }
 0x4e9   :  { %1418 = vmatprep.subr.mxu1 %v641_v11 }
 0x4ea   :  { %1419 = vmatpush3.msra.mxu1 %v641_v11 }
 0x4eb   :  { %1420 = vmatprep.subr.mxu1 %v640_v6 }
 0x4ec   :  { %1421 = vmatpush3.msra.mxu1 %v640_v6 }
 0x4ed   :  { %1422 = vmatprep.subr.mxu1 %v639_v12 }
 0x4ee   :  { %1423 = vmatpush3.msra.mxu1 %v639_v12 }
 0x4ef   :  { %1424 = vmatprep.subr.mxu1 %v638_v13 }
 0x4f0   :  { %1425 = vmatpush3.msra.mxu1 %v638_v13 }
 0x4f1   :  { %1426 = vmatprep.subr.mxu1 %v637_v14 }
 0x4f2   :  { %1427 = vmatpush3.msra.mxu1 %v637_v14 }
 0x4f3   :  { %1428 = vmatprep.subr.mxu1 %v636_v15 }
 0x4f4   :  { %1429 = vmatpush3.msra.mxu1 %v636_v15 }
 0x4f5   :  { %1430 = vmatprep.subr.mxu1 %v635_v16 }
 0x4f6   :  { %1431 = vmatpush3.msra.mxu1 %v635_v16 }
 0x4f7   :  { %1432 = vmatprep.subr.mxu1 %v634_v17 }
 0x4f8   :  { %1433 = vmatpush3.msra.mxu1 %v634_v17 }
 0x4f9   :  { %1434 = vmatprep.subr.mxu1 %v633_v18 }
 0x4fa   :  { %1435 = vmatpush3.msra.mxu1 %v633_v18 }
 0x4fb   :  { %1436 = vmatprep.subr.mxu1 %v632_v19 }
 0x4fc   :  { %1437 = vmatpush3.msra.mxu1 %v632_v19 }
 0x4fd   :  { %1438 = vmatprep.subr.mxu1 %v631_v20 }
 0x4fe   :  { %1439 = vmatpush3.msra.mxu1 %v631_v20 }
 0x4ff   :  { %1440 = vmatprep.subr.mxu1 %v630_v21 }
 0x500   :  { %1441 = vmatpush3.msra.mxu1 %v630_v21 }
 0x501   :  { %1442 = vmatprep.subr.mxu1 %v629_v22 }
 0x502   :  { %1443 = vmatpush3.msra.mxu1 %v629_v22 }
 0x503   :  { %1444 = vmatprep.subr.mxu1 %v628_v24 }
 0x504   :  { %1445 = vmatpush3.msra.mxu1 %v628_v24 }
 0x505   :  { %1446 = vmatprep.subr.mxu1 %v627_v25 }
 0x506   :  { %1447 = vmatpush3.msra.mxu1 %v627_v25 }
 0x5a7   :  { %v1415_v29 = vpop.f32.mrf.mxu1 }
 0x5a8   :  { %v899_v34 = vadd.f32 %v1415_v29, %v1910_v31 }
 0x5a9   :  { %v893_v32 = vpop.f32.mrf.mxu1 }
 0x5aa   :  { %v894_v33 = vadd.f32 %v893_v32, %v1908_v30 }
 0x5ac   :  { %1448 = vmatprep.mubr.f32.mxu1 %v894_v33 }
 0x5ad   :  { %1449 = vmatmul.mubr.f32.vlgmr.msra.gmra.mxu1 %v899_v34 }
 0x66d   :  { %v1450_v35 = vpop.f32.mrf.mxu1 }
 0x66e   :  { %1451 = vmatprep.subr.mxu0 %v1450_v35 }
 0x66f   :  { %v968_v36 = vpop.f32.mrf.mxu1  ;;  %1452 = vmatpush3.msra.mxu0 %v1450_v35 }
 0x670   :  { %1453 = vmatprep.subr.mxu0 %v968_v36 }
 0x671   :  { %1454 = vmatpush3.msra.mxu0 %v968_v36 }
 0x672   :  { %1456 = vmatmul.mubr.msk.f32.vlgmr.msra.gmra.mxu0 %vm156_vm0, %v1760_v23  ;;  %1458 = vmatprep.subr.mxu0 %v663_v37  ;;  %v658_v23 = vld [vmem:[%s1989_s11 + $0x50] sm:$0xff] }
 0x673   :  { %1459 = vmatpush3.msra.mxu0 %v663_v37 }
 0x674   :  { %1460 = vmatprep.subr.mxu0 %v662_v38 }
 0x675   :  { %1461 = vmatpush3.msra.mxu0 %v662_v38 }
 0x676   :  { %1462 = vmatprep.subr.mxu0 %v661_v39 }
 0x677   :  { %1463 = vmatpush3.msra.mxu0 %v661_v39 }
 0x678   :  { %1464 = vmatprep.subr.mxu0 %v660_v40 }
 0x679   :  { %1465 = vmatpush3.msra.mxu0 %v660_v40 }
 0x67a   :  { %1466 = vmatprep.subr.mxu0 %v659_v41 }
 0x67b   :  { %1467 = vmatpush3.msra.mxu0 %v659_v41 }
 0x67c   :  { %1468 = vmatprep.subr.mxu0 %v658_v23 }
 0x67d   :  { %1469 = vmatpush3.msra.mxu0 %v658_v23 }
 0x67e   :  { %1470 = vmatprep.subr.mxu0 %v657_v42 }
 0x67f   :  { %1471 = vmatpush3.msra.mxu0 %v657_v42 }
 0x680   :  { %1472 = vmatprep.subr.mxu0 %v656_v43 }
 0x681   :  { %1473 = vmatpush3.msra.mxu0 %v656_v43 }
 0x682   :  { %1474 = vmatprep.subr.mxu0 %v655_v44 }
 0x683   :  { %1475 = vmatpush3.msra.mxu0 %v655_v44 }
 0x684   :  { %1476 = vmatprep.subr.mxu0 %v654_v45 }
 0x685   :  { %1477 = vmatpush3.msra.mxu0 %v654_v45 }
 0x686   :  { %1478 = vmatprep.subr.mxu0 %v653_v46 }
 0x687   :  { %1479 = vmatpush3.msra.mxu0 %v653_v46 }
 0x688   :  { %1480 = vmatprep.subr.mxu0 %v652_v47 }
 0x689   :  { %1481 = vmatpush3.msra.mxu0 %v652_v47 }
 0x68a   :  { %1482 = vmatprep.subr.mxu0 %v651_v48 }
 0x68b   :  { %1483 = vmatpush3.msra.mxu0 %v651_v48 }
 0x68c   :  { %1484 = vmatprep.subr.mxu0 %v650_v49 }
 0x68d   :  { %1485 = vmatpush3.msra.mxu0 %v650_v49 }
 0x68e   :  { %1486 = vmatprep.subr.mxu0 %v649_v50 }
 0x68f   :  { %1487 = vmatpush3.msra.mxu0 %v649_v50 }
 0x690   :  { %1488 = vmatprep.subr.mxu0 %v648_v51 }
 0x691   :  { %1489 = vmatpush3.msra.mxu0 %v648_v51 }
 0x732   :  { %v1457_v52 = vpop.f32.mrf.mxu0 }
 0x733   :  { %v1049_v55 = vadd.f32 %v1457_v52, %v1910_v31 }
 0x734   :  { %v1043_v53 = vpop.f32.mrf.mxu0 }
 0x735   :  { %v1044_v54 = vadd.f32 %v1043_v53, %v1908_v30 }
 0x737   :  { %1490 = vmatprep.mubr.f32.mxu0 %v1044_v54 }
 0x738   :  { %1491 = vmatmul.mubr.f32.vlgmr.msra.gmra.mxu0 %v1049_v55 }
 0x7f8   :  { %v1492_v56 = vpop.f32.mrf.mxu0 }
 0x7f9   :  { %v1131_v59 = vsel %vm1127_vm2, %v1492_v56, -inf }
 0x7fa   :  { %v1118_v57 = vpop.f32.mrf.mxu0 }
 0x7fb   :  { %v1128_v58 = vsel %vm1127_vm2, %v1118_v57, -inf }
 0x7fc   :  { %1129 = vmax.xlane.f32.xlu0 %v1128_v58 }
 0x800   :  { %1132 = vmax.xlane.f32.xlu0 %v1131_v59 }
 0x885   :  { %v1130_v60 = vpop.xlane.xlu0 %1129 }
 0x886   :  { %v1134_v61 = vsub.f32 %v1118_v57, %v1130_v60 }
 0x888   :  { %v1136_v62 = vmul.f32 1.442695, %v1134_v61 }
 0x889   :  { %v1133_v63 = vpop.xlane.xlu0 %1132 }
 0x88a   :  { %1500 = vpow2.f32 %v1136_v62  ;;  %v1135_v0 = vsub.f32 %v1492_v56, %v1133_v63 }
 0x88c   :  { %v1138_v1 = vmul.f32 1.442695, %v1135_v0 }
 0x88e   :  { %1502 = vpow2.f32 %v1138_v1 }
 0x897   :  { %v1501_v2 = vpop.eup %1500 }
 0x898   :  { %v1140_v3 = vsel %vm1127_vm2, %v1501_v2, 0.0 }
 0x899   :  { %1141 = vadd.xlane.f32.xlu1 %v1140_v3 }
 0x89b   :  { %v1503_v4 = vpop.eup %1502 }
 0x89c   :  { %v1143_v5 = vsel %vm1127_vm2, %v1503_v4, 0.0 }
 0x89d   :  { %1144 = vadd.xlane.f32.xlu1 %v1143_v5 }
 0x922   :  { %v1142_v7 = vpop.xlane.xlu1 %1141 }
 0x923   :  { %1504 = vlog2.f32 %v1142_v7 }
 0x926   :  { %v1145_v8 = vpop.xlane.xlu1 %1144 }
 0x927   :  { %1506 = vlog2.f32 %v1145_v8 }
 0x930   :  { %v1505_v9 = vpop.eup %1504 }
 0x931   :  { %v1147_v10 = vmul.f32 0.6931472, %v1505_v9 }
 0x933   :  { %v1150_v11 = vadd.f32 %v1147_v10, %v1130_v60 }
 0x934   :  { %v1507_v6 = vpop.eup %1506 }
 0x935   :  { %v1152_v12 = vsub.f32 %v1118_v57, %v1150_v11  ;;  %v1149_v13 = vmul.f32 0.6931472, %v1507_v6 }
 0x937   :  { %1154 = vst.msk [vmem:[%s1990_s12] sm:$0xff] %vm1127_vm2, %v1152_v12  ;;  %v1151_v14 = vadd.f32 %v1149_v13, %v1133_v63 }
 0x939   :  { %v1153_v15 = vsub.f32 %v1492_v56, %v1151_v14 }
 0x93b   :  { %1155 = vst.msk [vmem:[%s1990_s12 + $0x8] sm:$0xff] %vm1127_vm2, %v1153_v15 }
 0x93c   :  { %1160 = vsyncpa [#allocation3], 1 }
 0x93d   :  { %1161 = vsyncpa [#allocation5], 1 }
 0x93e   :  { %1162 = vsyncpa [#allocation8], 1 }

</bundles_post_ra>
